<compile_context>
chip_gen: v7x
topology: tpu7x:2x2x1
jax: 0.10.0
libtpu: 0.0.40
codegen_flags: <defaults>
</compile_context>

<pallas_src>
import functools

import jax
import jax.numpy as jnp
from jax.experimental import pallas as pl
from jax.experimental.pallas import tpu as pltpu

EPS = 1e-6


def _ce_dice_partials_kernel(x_ref, t_ref, out_ref, *, has_pad):
    """Accumulate vreg-shaped per-(slot, batch, class) partials over one pixel tile.

    Slot order along the flattened leading output axis (4 * B * C):
      0: one-hot pixel count        1: intersection (softmax at target class)
      2: sum of softmax             3: per-pixel NLL routed to its target class
    """
    p = pl.program_id(1)

    @pl.when(p == 0)
    def _init():
        out_ref[...] = jnp.zeros_like(out_ref)

    x = x_ref[...].astype(jnp.float32)          # (B, C, tpn, 128) f32
    t = t_ref[...]                              # (B, tpn, 128)   i32
    B, C, tpn, L = x.shape
    S = tpn // 8                                # tpn is a multiple of 8 by construction

    # Softmax / log-sum-exp over the (leading) class axis: pure VPU max/add across vreg
    # slabs — no XLU reductions on the hot path.
    m = jnp.max(x, axis=1, keepdims=True)       # (B, 1, tpn, 128)
    e = jnp.exp(x - m)
    s = jnp.sum(e, axis=1, keepdims=True)
    soft = e * pl.reciprocal(s)                 # exact reciprocal (Dice fidelity)
    lse = m + jnp.log(s)                        # (B, 1, tpn, 128)

    # Lazy one-hot: boolean class mask, never materialized as f32.
    cls = jax.lax.broadcasted_iota(jnp.int32, (1, C, tpn, L), 1)
    mask = cls == t[:, None, :, :]              # (B, C, tpn, 128) bool

    zero = jnp.float32(0.0)
    cnt_px = mask.astype(jnp.float32)
    inter_px = jnp.where(mask, soft, zero)
    nll_px = jnp.where(mask, lse - x, zero)     # -log softmax[target], routed to class
    if has_pad:
        # Padded pixels carry the out-of-range sentinel class C: the one-hot mask is
        # already all-False for them; only the raw softmax sum needs explicit masking.
        valid = (t < C)[:, None, :, :]
        ssum_px = jnp.where(valid, soft, zero)
    else:
        ssum_px = soft

    def tile_sum(v):
        # (B, C, tpn, 128) -> (B*C, 8, 128); leading-axis sum = VPU vreg adds only.
        return jnp.sum(v.reshape(B, C, S, 8, L), axis=2).reshape(B * C, 8, L)

    partial = jnp.concatenate(
        [tile_sum(cnt_px), tile_sum(inter_px), tile_sum(ssum_px), tile_sum(nll_px)],
        axis=0)                                  # (4*B*C, 8, 128)
    out_ref[0] += partial                        # single fused accumulator update


def _round_up(a, b):
    return ((a + b - 1) // b) * b


def _tpu_config():
    """Generation-aware (n_parallel, f32 block byte target, VMEM limit cap)."""
    try:
        kind = jax.devices()[0].device_kind.lower()
    except Exception:
        kind = ""
    if "v7" in kind:
        # 2 TensorCores, 64 MiB VMEM per TC: modest blocks, tight budget, 2-way split.
        return 2, 2 << 20, 48 << 20
    if "v5" in kind or "v6" in kind:
        # Single TensorCore, 128 MiB VMEM: larger blocks amortize per-step overhead.
        return 1, 4 << 20, 96 << 20
    # Unknown generation: conservative defaults.
    return 1, 2 << 20, 48 << 20


def _choose_tiling(P, B, C, x_dtype):
    """Pick (n_par, tpn, npt, NP, vmem_limit) with NP = n_par*npt*tpn 128-pixel rows."""
    n_par, blk_f32_target, vmem_cap = _tpu_config()

    row_f32 = B * C * 128 * 4                    # f32 bytes per 128-pixel row of logits
    cap_rows = max(8, (blk_f32_target // row_f32) // 8 * 8)

    NP0 = pl.cdiv(P, 128)
    chunk = _round_up(NP0, 8 * n_par) // n_par   # rows per parallel chunk (multiple of 8)

    # Largest tile (multiple of 8 rows, <= cap) whose extra padding is <= ~12.5%.
    tpn = 8
    start = min(cap_rows, _round_up(chunk, 8))
    for cand in range(start, 7, -8):
        extra = _round_up(chunk, cand) - chunk
        if extra <= chunk // 8:
            tpn = cand
            break
    chunk = _round_up(chunk, tpn)
    npt = chunk // tpn
    NP = n_par * chunk

    dbytes = jnp.dtype(x_dtype).itemsize
    blk_x = B * C * tpn * 128 * dbytes
    blk_xf = B * C * tpn * 128 * 4
    blk_t = B * tpn * 128 * 4
    blk_o = 4 * B * C * 8 * 128 * 4
    # Honest budget: double-buffered operands/output + ~10 tile-sized f32 intermediates.
    need = 2 * (blk_x + blk_t + blk_o) + 10 * blk_xf
    vmem_limit = int(min(vmem_cap, max(32 << 20, int(need * 1.25))))
    return n_par, tpn, npt, NP, vmem_limit


def ce_dice_loss(logits_nchw, target_bhw, weights):
    """logits_nchw: (B,C,H,W) float (f32 or bf16); target_bhw: (B,H,W) int;
    weights: (1,C), summing to 1 (as the PyTorch module requires)."""
    B, C, H, W = logits_nchw.shape
    P = H * W
    x = logits_nchw.reshape(B, C, P)             # keep native dtype (bf16 stays bf16)
    t = target_bhw.reshape(B, P).astype(jnp.int32)
    w = weights.reshape(1, C).astype(jnp.float32)

    n_par, tpn, npt, NP, vmem_limit = _choose_tiling(P, B, C, x.dtype)
    P_pad = NP * 128
    has_pad = P_pad != P
    if has_pad:
        x = jnp.pad(x, ((0, 0), (0, 0), (0, P_pad - P)))
        t = jnp.pad(t, ((0, 0), (0, P_pad - P)), constant_values=C)  # sentinel class

    x = x.reshape(B, C, NP, 128)
    t = t.reshape(B, NP, 128)

    kernel = functools.partial(_ce_dice_partials_kernel, has_pad=has_pad)
    partials = pl.pallas_call(
        kernel,
        out_shape=jax.ShapeDtypeStruct((n_par, 4 * B * C, 8, 128), jnp.float32),
        grid_spec=pltpu.PrefetchScalarGridSpec(
            num_scalar_prefetch=0,
            grid=(n_par, npt),
            in_specs=[
                pl.BlockSpec((B, C, tpn, 128), lambda a, p: (0, 0, a * npt + p, 0)),
                pl.BlockSpec((B, tpn, 128), lambda a, p: (0, a * npt + p, 0)),
            ],
            out_specs=pl.BlockSpec((1, 4 * B * C, 8, 128), lambda a, p: (a, 0, 0, 0)),
        ),
        compiler_params=pltpu.CompilerParams(
            dimension_semantics=("parallel", "arbitrary"),
            vmem_limit_bytes=vmem_limit,
        ),
    )(x, t)

    # Tiny finalize in JAX: the only lane/sublane reduction of the whole pipeline.
    parts = jnp.sum(partials.reshape(n_par, 4, B, C, 8, 128), axis=(0, 4, 5))
    cnt, inter, ssum, nll = parts[0], parts[1], parts[2], parts[3]

    celoss = jnp.sum(nll * w) / jnp.sum(cnt * w)     # weighted CE, 'mean' reduction
    dice = 2.0 * inter / (ssum + cnt + EPS)          # (B, C)
    dice_w = jnp.sum(dice * w, axis=1)               # (B,)
    return jnp.mean(1.0 - dice_w) + celoss


if __name__ == "__main__":
    B, C, H, W = 2, 4, 16, 16
    key = jax.random.PRNGKey(0)
    k_logits, k_target = jax.random.split(key)

    logits = jax.random.normal(k_logits, (B, C, H, W), dtype=jnp.float32)
    target = jax.random.randint(k_target, (B, H, W), 0, C, dtype=jnp.int32)
    # Deterministic per-class weights, shape (1, C), summing to 1 (module requirement).
    weights = jnp.array([[0.1, 0.2, 0.3, 0.4]], dtype=jnp.float32)

    loss = jax.jit(ce_dice_loss)(logits, target, weights)
    jax.block_until_ready(loss)
    print("KERNEL_OK")
</pallas_src>

<mosaic_0001>
module attributes {stable_mosaic.version = 11 : i64} {
  func.func @_ce_dice_partials_kernel(%arg0: i32, %arg1: i32, %arg2: memref<2x4x8x128xf32, #tpu.memory_space<vmem>>, %arg3: memref<2x8x128xi32, #tpu.memory_space<vmem>>, %arg4: memref<1x32x8x128xf32, #tpu.memory_space<vmem>>) attributes {dimension_semantics = [#tpu.dimension_semantics<parallel>, #tpu.dimension_semantics<arbitrary>], iteration_bounds = array<i64: 1, 1>, scalar_prefetch = 0 : i64, scratch_operands = 0 : i64, tpu.core_type = #tpu.core_type<tc>, window_params = [{transform_indices = @transform_0, window_bounds = array<i64: 2, 4, 8, 128>}, {transform_indices = @transform_1, window_bounds = array<i64: 2, 8, 128>}, {transform_indices = @transform_2, window_bounds = array<i64: 1, 32, 8, 128>}]} {
    %c0_i32 = arith.constant 0 : i32
    %0 = arith.cmpi eq, %arg1, %c0_i32 : i32
    %1 = arith.extui %0 : i1 to i32
    %c0_i32_0 = arith.constant 0 : i32
    %2 = arith.cmpi ne, %1, %c0_i32_0 : i32
    scf.if %2 {
      %cst_23 = arith.constant 0.000000e+00 : f32
      %56 = vector.broadcast %cst_23 : f32 to vector<1x32x8x128xf32>
      %c0_24 = arith.constant 0 : index
      %c0_25 = arith.constant 0 : index
      %c0_26 = arith.constant 0 : index
      %c0_27 = arith.constant 0 : index
      %57 = vector.load %arg4[%c0_24, %c0_25, %c0_26, %c0_27] : memref<1x32x8x128xf32, #tpu.memory_space<vmem>>, vector<1x32x8x128xf32>
      tpu.vector_store %arg4[%c0_24, %c0_25, %c0_26, %c0_27], %56 {strides = array<i32>} : memref<1x32x8x128xf32, #tpu.memory_space<vmem>>, vector<1x32x8x128xf32>,
    } else {
    }
    %c0 = arith.constant 0 : index
    %c0_1 = arith.constant 0 : index
    %c0_2 = arith.constant 0 : index
    %c0_3 = arith.constant 0 : index
    %3 = vector.load %arg2[%c0, %c0_1, %c0_2, %c0_3] : memref<2x4x8x128xf32, #tpu.memory_space<vmem>>, vector<2x4x8x128xf32>
    %c0_4 = arith.constant 0 : index
    %c0_5 = arith.constant 0 : index
    %c0_6 = arith.constant 0 : index
    %4 = vector.load %arg3[%c0_4, %c0_5, %c0_6] : memref<2x8x128xi32, #tpu.memory_space<vmem>>, vector<2x8x128xi32>
    %cst = arith.constant dense<0xFF800000> : vector<2x8x128xf32>
    %5 = vector.multi_reduction <maximumf>, %3, %cst [1] : vector<2x4x8x128xf32> to vector<2x8x128xf32>
    %6 = vector.shape_cast %5 : vector<2x8x128xf32> to vector<2x1x8x128xf32>
    %7 = vector.broadcast %6 : vector<2x1x8x128xf32> to vector<2x4x8x128xf32>
    %8 = arith.subf %3, %7 : vector<2x4x8x128xf32>
    %9 = math.exp %8 : vector<2x4x8x128xf32>
    %cst_7 = arith.constant dense<0.000000e+00> : vector<2x8x128xf32>
    %10 = vector.multi_reduction <add>, %9, %cst_7 [1] : vector<2x4x8x128xf32> to vector<2x8x128xf32>
    %11 = vector.shape_cast %10 : vector<2x8x128xf32> to vector<2x1x8x128xf32>
    %12 = tpu.reciprocal %11 : vector<2x1x8x128xf32> -> vector<2x1x8x128xf32>
    %13 = vector.broadcast %12 : vector<2x1x8x128xf32> to vector<2x4x8x128xf32>
    %14 = arith.mulf %9, %13 : vector<2x4x8x128xf32>
    %15 = math.log %11 : vector<2x1x8x128xf32>
    %16 = arith.addf %6, %15 : vector<2x1x8x128xf32>
    %17 = tpu.iota {dimensions = array<i32: 1>} : vector<1x4x8x128xi32>
    %18 = vector.shape_cast %4 : vector<2x8x128xi32> to vector<2x1x8x128xi32>
    %19 = vector.broadcast %17 : vector<1x4x8x128xi32> to vector<2x4x8x128xi32>
    %20 = vector.broadcast %18 : vector<2x1x8x128xi32> to vector<2x4x8x128xi32>
    %21 = arith.cmpi eq, %19, %20 : vector<2x4x8x128xi32>
    %22 = arith.extui %21 : vector<2x4x8x128xi1> to vector<2x4x8x128xi32>
    %23 = arith.sitofp %22 : vector<2x4x8x128xi32> to vector<2x4x8x128xf32>
    %cst_8 = arith.constant 0.000000e+00 : f32
    %24 = vector.broadcast %cst_8 : f32 to vector<2x4x8x128xf32>
    %25 = arith.select %21, %14, %24 : vector<2x4x8x128xi1>, vector<2x4x8x128xf32>
    %26 = vector.broadcast %16 : vector<2x1x8x128xf32> to vector<2x4x8x128xf32>
    %27 = arith.subf %26, %3 : vector<2x4x8x128xf32>
    %cst_9 = arith.constant 0.000000e+00 : f32
    %28 = vector.broadcast %cst_9 : f32 to vector<2x4x8x128xf32>
    %29 = arith.select %21, %27, %28 : vector<2x4x8x128xi1>, vector<2x4x8x128xf32>
    %c4_i32 = arith.constant 4 : i32
    %30 = vector.broadcast %c4_i32 : i32 to vector<2x8x128xi32>
    %31 = arith.cmpi slt, %4, %30 : vector<2x8x128xi32>
    %32 = vector.shape_cast %31 : vector<2x8x128xi1> to vector<2x1x8x128xi1>
    %cst_10 = arith.constant 0.000000e+00 : f32
    %33 = vector.shape_cast %32 : vector<2x1x8x128xi1> to vector<2x1x8x128xi1>
    %34 = vector.broadcast %33 : vector<2x1x8x128xi1> to vector<2x4x8x128xi1>
    %35 = vector.broadcast %cst_10 : f32 to vector<2x4x8x128xf32>
    %36 = arith.select %34, %14, %35 : vector<2x4x8x128xi1>, vector<2x4x8x128xf32>
    %37 = vector.shape_cast %23 : vector<2x4x8x128xf32> to vector<2x4x1x8x128xf32>
    %cst_11 = arith.constant dense<0.000000e+00> : vector<2x4x8x128xf32>
    %38 = vector.multi_reduction <add>, %37, %cst_11 [2] : vector<2x4x1x8x128xf32> to vector<2x4x8x128xf32>
    %39 = vector.shape_cast %38 : vector<2x4x8x128xf32> to vector<8x8x128xf32>
    %40 = vector.shape_cast %25 : vector<2x4x8x128xf32> to vector<2x4x1x8x128xf32>
    %cst_12 = arith.constant dense<0.000000e+00> : vector<2x4x8x128xf32>
    %41 = vector.multi_reduction <add>, %40, %cst_12 [2] : vector<2x4x1x8x128xf32> to vector<2x4x8x128xf32>
    %42 = vector.shape_cast %41 : vector<2x4x8x128xf32> to vector<8x8x128xf32>
    %43 = vector.shape_cast %36 : vector<2x4x8x128xf32> to vector<2x4x1x8x128xf32>
    %cst_13 = arith.constant dense<0.000000e+00> : vector<2x4x8x128xf32>
    %44 = vector.multi_reduction <add>, %43, %cst_13 [2] : vector<2x4x1x8x128xf32> to vector<2x4x8x128xf32>
    %45 = vector.shape_cast %44 : vector<2x4x8x128xf32> to vector<8x8x128xf32>
    %46 = vector.shape_cast %29 : vector<2x4x8x128xf32> to vector<2x4x1x8x128xf32>
    %cst_14 = arith.constant dense<0.000000e+00> : vector<2x4x8x128xf32>
    %47 = vector.multi_reduction <add>, %46, %cst_14 [2] : vector<2x4x1x8x128xf32> to vector<2x4x8x128xf32>
    %48 = vector.shape_cast %47 : vector<2x4x8x128xf32> to vector<8x8x128xf32>
    %49 = tpu.concatenate %39, %42, %45, %48 in 0 : vector<8x8x128xf32>, vector<8x8x128xf32>, vector<8x8x128xf32>, vector<8x8x128xf32> -> vector<32x8x128xf32>
    %c0_15 = arith.constant 0 : index
    %c0_16 = arith.constant 0 : index
    %c0_17 = arith.constant 0 : index
    %c0_18 = arith.constant 0 : index
    %50 = vector.load %arg4[%c0_15, %c0_16, %c0_17, %c0_18] : memref<1x32x8x128xf32, #tpu.memory_space<vmem>>, vector<1x32x8x128xf32>
    %51 = vector.shape_cast %50 : vector<1x32x8x128xf32> to vector<32x8x128xf32>
    %52 = arith.addf %51, %49 : vector<32x8x128xf32>
    %c0_19 = arith.constant 0 : index
    %c0_20 = arith.constant 0 : index
    %c0_21 = arith.constant 0 : index
    %c0_22 = arith.constant 0 : index
    %53 = vector.load %arg4[%c0_19, %c0_20, %c0_21, %c0_22] : memref<1x32x8x128xf32, #tpu.memory_space<vmem>>, vector<1x32x8x128xf32>
    %54 = vector.shape_cast %53 : vector<1x32x8x128xf32> to vector<32x8x128xf32>
    %55 = vector.shape_cast %52 : vector<32x8x128xf32> to vector<1x32x8x128xf32>
    tpu.vector_store %arg4[%c0_19, %c0_20, %c0_21, %c0_22], %55 {strides = array<i32>} : memref<1x32x8x128xf32, #tpu.memory_space<vmem>>, vector<1x32x8x128xf32>,
    return
  }
  func.func @transform_0(%arg0: i32, %arg1: i32) -> (i32, i32, i32, i32) {
    %c1_i32 = arith.constant 1 : i32
    %0 = arith.muli %arg0, %c1_i32 : i32
    %1 = arith.addi %0, %arg1 : i32
    %c0_i32 = arith.constant 0 : i32
    %c0_i32_0 = arith.constant 0 : i32
    %c0_i32_1 = arith.constant 0 : i32
    %c0_i32_2 = arith.constant 0 : i32
    return %c0_i32, %c0_i32_0, %1, %c0_i32_1 : i32, i32, i32, i32
  }
  func.func @transform_1(%arg0: i32, %arg1: i32) -> (i32, i32, i32) {
    %c1_i32 = arith.constant 1 : i32
    %0 = arith.muli %arg0, %c1_i32 : i32
    %1 = arith.addi %0, %arg1 : i32
    %c0_i32 = arith.constant 0 : i32
    %c0_i32_0 = arith.constant 0 : i32
    %c0_i32_1 = arith.constant 0 : i32
    return %c0_i32, %1, %c0_i32_0 : i32, i32, i32
  }
  func.func @transform_2(%arg0: i32, %arg1: i32) -> (i32, i32, i32, i32) {
    %c0_i32 = arith.constant 0 : i32
    %c0_i32_0 = arith.constant 0 : i32
    %c0_i32_1 = arith.constant 0 : i32
    %c0_i32_2 = arith.constant 0 : i32
    return %arg0, %c0_i32, %c0_i32_0, %c0_i32_1 : i32, i32, i32, i32
  }
}

</mosaic_0001>

<bundles_post_ra>
// kernel: ce_dice_loss.1
= control target key start
LH: loop header
LB: loop body
LE: loop exit
PB: predicated region body
PF: predicated region fallthrough
CT: control target
= control target key end

     0   :  { %v382_v2 = vmov 0.0   ;;  %s656_s1 = inlined_call_operand.vmem [shape: s32[2,8,128], index: 1, kind: input, shape index: {}]   ;;  %s657_s0 = inlined_call_operand.vmem [shape: f32[2,4,8,128], index: 0, kind: input, shape index: {}]   ;;  %s658_s2 = inlined_call_operand.vmem [shape: f32[1,32,8,128], index: 2, kind: output, shape index: {}]  }
   0x1   :  { %v401_v0 = vld [vmem:[%s656_s1] sm:$0xff]  ;;  %v410_v1 = vld [vmem:[%s656_s1 + $0x8] sm:$0xff]  ;;  %v433_v9 = vld [vmem:[%s657_s0 + $0x10] sm:$0xff] }
   0x2   :  { %vm143_vm0 = vcmp.eq.s32.totalorder %v401_v0, 0  ;;  %vm144_vm1 = vcmp.eq.s32.totalorder %v401_v0, 1  ;;  %vm145_vm2 = vcmp.eq.s32.totalorder %v401_v0, 2  ;;  %vm146_vm3 = vcmp.eq.s32.totalorder %v401_v0, 3  ;;  %v423_v7 = vld [vmem:[%s657_s0] sm:$0xff]  ;;  %v428_v8 = vld [vmem:[%s657_s0 + $0x8] sm:$0xff] }
   0x3   :  { %v349_v3 = vsel %vm143_vm0, 1.0, %v382_v2  ;;  %v350_v4 = vsel %vm144_vm1, 1.0, %v382_v2  ;;  %v351_v5 = vsel %vm145_vm2, 1.0, %v382_v2  ;;  %v352_v6 = vsel %vm146_vm3, 1.0, %v382_v2  ;;  %v438_v10 = vld [vmem:[%s657_s0 + $0x18] sm:$0xff]  ;;  %v443_v11 = vld [vmem:[%s657_s0 + $0x20] sm:$0xff] }
   0x4   :  { %v448_v12 = vld [vmem:[%s657_s0 + $0x28] sm:$0xff]  ;;  %vm147_vm4 = vcmp.eq.s32.totalorder %v410_v1, 0  ;;  %vm148_vm5 = vcmp.eq.s32.totalorder %v410_v1, 1  ;;  %vm149_vm6 = vcmp.eq.s32.totalorder %v410_v1, 2  ;;  %vm150_vm7 = vcmp.eq.s32.totalorder %v410_v1, 3  ;;  %v457_v13 = vld [vmem:[%s657_s0 + $0x30] sm:$0xff]  ;;  %301 = vst [vmem:[%s658_s2] sm:$0xff] %v349_v3 }
   0x5   :  { %v462_v14 = vld [vmem:[%s657_s0 + $0x38] sm:$0xff]  ;;  %302 = vst [vmem:[%s658_s2 + $0x8] sm:$0xff] %v350_v4  ;;  %303 = vst [vmem:[%s658_s2 + $0x10] sm:$0xff] %v351_v5  ;;  %v353_v15 = vsel %vm147_vm4, 1.0, %v382_v2  ;;  %v354_v16 = vsel %vm148_vm5, 1.0, %v382_v2  ;;  %v355_v17 = vsel %vm149_vm6, 1.0, %v382_v2  ;;  %v91_v19 = vmax.f32 %v423_v7, %v433_v9 }
   0x6   :  { %304 = vst [vmem:[%s658_s2 + $0x18] sm:$0xff] %v352_v6  ;;  %v356_v18 = vsel %vm150_vm7, 1.0, %v382_v2  ;;  %v92_v20 = vmax.f32 %v428_v8, %v438_v10  ;;  %v94_v21 = vmax.f32 %v443_v11, %v457_v13  ;;  %v95_v22 = vmax.f32 %v448_v12, %v462_v14  ;;  %305 = vst [vmem:[%s658_s2 + $0x20] sm:$0xff] %v353_v15 }
   0x7   :  { %306 = vst [vmem:[%s658_s2 + $0x28] sm:$0xff] %v354_v16  ;;  %307 = vst [vmem:[%s658_s2 + $0x30] sm:$0xff] %v355_v17  ;;  %vm191_vm8 = vcmp.lt.s32.totalorder %v401_v0, 4  ;;  %vm192_vm9 = vcmp.lt.s32.totalorder %v410_v1, 4 }
   0x8   :  { %308 = vst [vmem:[%s658_s2 + $0x38] sm:$0xff] %v356_v18  ;;  %v504_v23 = vmax.f32 %v91_v19, %v92_v20  ;;  %v506_v24 = vmax.f32 %v94_v21, %v95_v22 }
   0xa   :  { %v97_v25 = vsub.f32 %v423_v7, %v504_v23  ;;  %v98_v26 = vsub.f32 %v428_v8, %v504_v23  ;;  %v99_v27 = vsub.f32 %v433_v9, %v504_v23  ;;  %v100_v28 = vsub.f32 %v438_v10, %v504_v23 }
   0xb   :  { %v101_v29 = vsub.f32 %v443_v11, %v506_v24  ;;  %v102_v30 = vsub.f32 %v448_v12, %v506_v24  ;;  %v103_v34 = vsub.f32 %v457_v13, %v506_v24  ;;  %v104_v36 = vsub.f32 %v462_v14, %v506_v24 }
   0xc   :  { %v105_v31 = vmul.f32 1.442695, %v97_v25  ;;  %v107_v32 = vmul.f32 1.442695, %v98_v26  ;;  %v109_v33 = vmul.f32 1.442695, %v99_v27 }
   0xd   :  { %v111_v35 = vmul.f32 1.442695, %v100_v28  ;;  %v113_v37 = vmul.f32 1.442695, %v101_v29  ;;  %v115_v38 = vmul.f32 1.442695, %v102_v30 }
   0xe   :  { %358 = vpow2.f32 %v105_v31  ;;  %v117_v39 = vmul.f32 1.442695, %v103_v34  ;;  %v119_v40 = vmul.f32 1.442695, %v104_v36 }
   0xf   :  { %360 = vpow2.f32 %v107_v32 }
  0x10   :  { %362 = vpow2.f32 %v109_v33 }
  0x11   :  { %364 = vpow2.f32 %v111_v35 }
  0x12   :  { %366 = vpow2.f32 %v113_v37 }
  0x13   :  { %368 = vpow2.f32 %v115_v38 }
  0x14   :  { %370 = vpow2.f32 %v117_v39 }
  0x15   :  { %372 = vpow2.f32 %v119_v40 }
  0x18   :  { %v359_v41 = vpop.eup %358 }
  0x19   :  { %v361_v42 = vpop.eup %360 }
  0x1a   :  { %v363_v43 = vpop.eup %362  ;;  %v121_v44 = vadd.f32 %v361_v42, %v359_v41 }
  0x1b   :  { %v365_v45 = vpop.eup %364 }
  0x1c   :  { %v367_v46 = vpop.eup %366  ;;  %v122_v47 = vadd.f32 %v363_v43, %v121_v44 }
  0x1d   :  { %v369_v48 = vpop.eup %368 }
  0x1e   :  { %v371_v49 = vpop.eup %370  ;;  %v123_v50 = vadd.f32 %v365_v45, %v122_v47  ;;  %v124_v51 = vadd.f32 %v369_v48, %v367_v46 }
  0x1f   :  { %v373_v52 = vpop.eup %372 }
  0x20   :  { %374 = vrcp.f32 %v123_v50  ;;  %v125_v53 = vadd.f32 %v371_v49, %v124_v51 }
  0x21   :  { %376 = vlog2.f32 %v123_v50 }
  0x22   :  { %v126_v54 = vadd.f32 %v373_v52, %v125_v53 }
  0x24   :  { %378 = vrcp.f32 %v126_v54 }
  0x25   :  { %380 = vlog2.f32 %v126_v54 }
  0x2a   :  { %v375_v55 = vpop.eup %374 }
  0x2b   :  { %v377_v56 = vpop.eup %376  ;;  %v129_v57 = vmul.f32 %v375_v55, %v359_v41  ;;  %v130_v58 = vmul.f32 %v375_v55, %v361_v42  ;;  %v131_v59 = vmul.f32 %v375_v55, %v363_v43  ;;  %v132_v60 = vmul.f32 %v375_v55, %v365_v45 }
  0x2c   :  { %v138_v61 = vmul.f32 0.6931472, %v377_v56 }
  0x2d   :  { %v167_v62 = vsel %vm143_vm0, %v129_v57, 0.0  ;;  %v168_v63 = vsel %vm144_vm1, %v130_v58, 0.0  ;;  %v169_v2 = vsel %vm145_vm2, %v131_v59, 0.0  ;;  %v170_v3 = vsel %vm146_vm3, %v132_v60, 0.0 }
  0x2e   :  { %v379_v4 = vpop.eup %378  ;;  %309 = vst [vmem:[%s658_s2 + $0x40] sm:$0xff] %v167_v62  ;;  %310 = vst [vmem:[%s658_s2 + $0x48] sm:$0xff] %v168_v63  ;;  %v197_v17 = vsel %vm191_vm8, %v129_v57, 0.0  ;;  %v198_v18 = vsel %vm191_vm8, %v130_v58, 0.0  ;;  %v199_v19 = vsel %vm191_vm8, %v131_v59, 0.0  ;;  %v200_v20 = vsel %vm191_vm8, %v132_v60, 0.0 }
  0x2f   :  { %v133_v5 = vmul.f32 %v379_v4, %v367_v46  ;;  %v134_v6 = vmul.f32 %v379_v4, %v369_v48  ;;  %v135_v15 = vmul.f32 %v379_v4, %v371_v49  ;;  %v136_v16 = vmul.f32 %v379_v4, %v373_v52  ;;  %311 = vst [vmem:[%s658_s2 + $0x50] sm:$0xff] %v169_v2  ;;  %v381_v27 = vpop.eup %380 }
  0x30   :  { %312 = vst [vmem:[%s658_s2 + $0x58] sm:$0xff] %v170_v3  ;;  %317 = vst [vmem:[%s658_s2 + $0x80] sm:$0xff] %v197_v17  ;;  %v141_v32 = vadd.f32 %v138_v61, %v504_v23  ;;  %v140_v33 = vmul.f32 0.6931472, %v381_v27 }
  0x31   :  { %v171_v21 = vsel %vm147_vm4, %v133_v5, 0.0  ;;  %v172_v22 = vsel %vm148_vm5, %v134_v6, 0.0  ;;  %v173_v25 = vsel %vm149_vm6, %v135_v15, 0.0  ;;  %v174_v26 = vsel %vm150_vm7, %v136_v16, 0.0  ;;  %318 = vst [vmem:[%s658_s2 + $0x88] sm:$0xff] %v198_v18  ;;  %319 = vst [vmem:[%s658_s2 + $0x90] sm:$0xff] %v199_v19 }
  0x32   :  { %313 = vst [vmem:[%s658_s2 + $0x60] sm:$0xff] %v171_v21  ;;  %314 = vst [vmem:[%s658_s2 + $0x68] sm:$0xff] %v172_v22  ;;  %v201_v28 = vsel %vm192_vm9, %v133_v5, 0.0  ;;  %v202_v29 = vsel %vm192_vm9, %v134_v6, 0.0  ;;  %v203_v30 = vsel %vm192_vm9, %v135_v15, 0.0  ;;  %v204_v31 = vsel %vm192_vm9, %v136_v16, 0.0 }
  0x33   :  { %315 = vst [vmem:[%s658_s2 + $0x70] sm:$0xff] %v173_v25  ;;  %316 = vst [vmem:[%s658_s2 + $0x78] sm:$0xff] %v174_v26  ;;  %v175_v34 = vsub.f32 %v141_v32, %v423_v7  ;;  %v176_v23 = vsub.f32 %v141_v32, %v428_v8  ;;  %v177_v35 = vsub.f32 %v141_v32, %v433_v9 }
  0x34   :  { %320 = vst [vmem:[%s658_s2 + $0x98] sm:$0xff] %v200_v20  ;;  %321 = vst [vmem:[%s658_s2 + $0xa0] sm:$0xff] %v201_v28  ;;  %v178_v36 = vsub.f32 %v141_v32, %v438_v10  ;;  %v142_v37 = vadd.f32 %v140_v33, %v506_v24 }
  0x35   :  { %322 = vst [vmem:[%s658_s2 + $0xa8] sm:$0xff] %v202_v29  ;;  %323 = vst [vmem:[%s658_s2 + $0xb0] sm:$0xff] %v203_v30  ;;  %v183_v38 = vsel %vm143_vm0, %v175_v34, 0.0  ;;  %v184_v39 = vsel %vm144_vm1, %v176_v23, 0.0  ;;  %v185_v40 = vsel %vm145_vm2, %v177_v35, 0.0 }
  0x36   :  { %324 = vst [vmem:[%s658_s2 + $0xb8] sm:$0xff] %v204_v31  ;;  %v186_v7 = vsel %vm146_vm3, %v178_v36, 0.0  ;;  %v179_v8 = vsub.f32 %v142_v37, %v443_v11  ;;  %v180_v9 = vsub.f32 %v142_v37, %v448_v12  ;;  %v181_v10 = vsub.f32 %v142_v37, %v457_v13  ;;  %325 = vst [vmem:[%s658_s2 + $0xc0] sm:$0xff] %v183_v38 }
  0x37   :  { %v182_v24 = vsub.f32 %v142_v37, %v462_v14  ;;  %326 = vst [vmem:[%s658_s2 + $0xc8] sm:$0xff] %v184_v39  ;;  %327 = vst [vmem:[%s658_s2 + $0xd0] sm:$0xff] %v185_v40 }
  0x38   :  { %328 = vst [vmem:[%s658_s2 + $0xd8] sm:$0xff] %v186_v7  ;;  %v187_v0 = vsel %vm147_vm4, %v179_v8, 0.0  ;;  %v188_v11 = vsel %vm148_vm5, %v180_v9, 0.0  ;;  %v189_v12 = vsel %vm149_vm6, %v181_v10, 0.0 }
  0x39   :  { %v190_v13 = vsel %vm150_vm7, %v182_v24, 0.0  ;;  %329 = vst [vmem:[%s658_s2 + $0xe0] sm:$0xff] %v187_v0  ;;  %330 = vst [vmem:[%s658_s2 + $0xe8] sm:$0xff] %v188_v11 }
  0x3a   :  { %331 = vst [vmem:[%s658_s2 + $0xf0] sm:$0xff] %v189_v12  ;;  %332 = vst [vmem:[%s658_s2 + $0xf8] sm:$0xff] %v190_v13 }

</bundles_post_ra>
